<compile_context>
chip_gen: v6e
topology: v6e:2x2x1
jax: 0.10.0
libtpu: 0.0.40
codegen_flags: <defaults>
</compile_context>

<pallas_src>
import jax
import jax.numpy as jnp
from jax.experimental import pallas as pl
from jax.experimental.pallas import tpu as pltpu


def drop_path_kernel(scale_ref, x_ref, o_ref):
    # scale_ref: (TB, 1, 1) block, same dtype as x  (per-sample mask / keep_prob)
    # x_ref/o_ref: (TB, TR, L) lane-dense blocks
    o_ref[...] = x_ref[...] * scale_ref[...]


def _choose_layout(B, N, itemsize, max_block_bytes=2 * 1024 * 1024, max_lane=4096):
    """Pick (rows, L, TB, TR) for the flattened (B, rows, L) view.

    Requires N % 128 == 0.  L is a multiple of 128; TR is a multiple of 8 or
    equals rows (the (8,128) block constraint); TB divides B.
    """
    # Lane width: largest 128-multiple divisor of N, capped at max_lane.
    L = 128
    d = 128
    while d <= min(N, max_lane):
        if N % d == 0:
            L = d
        d += 128
    rows = N // L
    sample_bytes = N * itemsize

    if sample_bytes <= max_block_bytes:
        # Whole sample fits in one block: pack several samples per grid step.
        tr = rows
        max_tb = max(1, max_block_bytes // sample_bytes)
        tb = 1
        for d in range(1, B + 1):
            if B % d == 0 and d <= max_tb:
                tb = d
    else:
        # Tile within a sample along the (128-aligned) row dimension.
        tb = 1
        max_tr = max(1, max_block_bytes // (L * itemsize))
        tr = None
        for d in range(1, rows + 1):
            if rows % d == 0 and (d % 8 == 0 or d == rows) and d <= max_tr:
                tr = d
        if tr is None:
            # No budget-fitting legal tile; take the smallest legal one.
            tr = next((d for d in range(8, rows, 8) if rows % d == 0), rows)

    # Keep >= 2 grid steps when possible so v7x megacore sharding applies.
    if (B // tb) * (rows // tr) == 1:
        if tb > 1:
            cands = [d for d in range(1, tb) if B % d == 0]
            if cands:
                tb = max(cands)
        elif tr > 1:
            cands = [d for d in range(1, tr)
                     if rows % d == 0 and (d % 8 == 0 or d == rows)]
            if cands:
                tr = max(cands)
    return rows, L, tb, tr


@jax.jit
def _drop_path_pallas(x, scale):
    """x: (B, ...) any-rank tensor; scale: (B,) f32 per-sample multiplier."""
    orig_shape = x.shape
    B = orig_shape[0]
    N = 1
    for s in orig_shape[1:]:
        N *= s

    x2 = x.reshape(B, N)
    pad = (-N) % 128
    Np = N + pad
    if pad:
        # Rare fallback for non-128-divisible samples (never hit by real
        # PoolFormer stages, where C*H*W is always 128-divisible).
        x2 = jnp.pad(x2, ((0, 0), (0, pad)))

    itemsize = jnp.dtype(x.dtype).itemsize
    rows, L, tb, tr = _choose_layout(B, Np, itemsize)
    x3 = x2.reshape(B, rows, L)
    scale3 = scale.astype(x.dtype).reshape(B, 1, 1)

    grid = (B // tb, rows // tr)
    total_bytes = B * Np * itemsize

    out = pl.pallas_call(
        drop_path_kernel,
        out_shape=jax.ShapeDtypeStruct((B, rows, L), x.dtype),
        grid_spec=pltpu.PrefetchScalarGridSpec(
            num_scalar_prefetch=0,
            grid=grid,
            in_specs=[
                # tiny per-sample scale, blocked per sample-group
                pl.BlockSpec((tb, 1, 1), lambda i, j: (i, 0, 0)),
                # lane-dense (TB, TR, L) slab
                pl.BlockSpec((tb, tr, L), lambda i, j: (i, j, 0)),
            ],
            out_specs=pl.BlockSpec((tb, tr, L), lambda i, j: (i, j, 0)),
        ),
        compiler_params=pltpu.CompilerParams(
            dimension_semantics=("parallel", "parallel"),
        ),
        cost_estimate=pl.CostEstimate(
            flops=B * Np,                      # one multiply per element
            transcendentals=0,
            bytes_accessed=2 * total_bytes + B * itemsize,
        ),
    )(scale3, x3)

    out2 = out.reshape(B, Np)
    if pad:
        out2 = out2[:, :N]
    return out2.reshape(orig_shape)


def poolformer_drop_path(x, drop_prob=0.0, training=False, key=None):
    """Faithful port of PoolFormerDropPath.forward (drop_path)."""
    if drop_prob == 0.0 or not training:
        # Identity: PyTorch returns the input tensor itself.
        return x
    if key is None:
        raise ValueError("training drop_path with drop_prob > 0 needs a PRNG key")
    keep_prob = 1.0 - drop_prob
    B = x.shape[0]
    # random_tensor = floor(keep_prob + U[0,1)) -> Bernoulli(keep_prob) per sample
    # TODO(synk): torch.rand RNG has no bit-exact JAX equivalent; jax.random is used.
    random_tensor = jnp.floor(
        keep_prob + jax.random.uniform(key, (B,), dtype=jnp.float32)
    )
    scale = (random_tensor / keep_prob).astype(jnp.float32)
    return _drop_path_pallas(x, scale)


def reference_drop_path(x, drop_prob, training, key):
    """Pure-JAX reference of the PyTorch forward (same RNG as the wrapper)."""
    if drop_prob == 0.0 or not training:
        return x
    keep_prob = 1.0 - drop_prob
    B = x.shape[0]
    random_tensor = jnp.floor(
        keep_prob + jax.random.uniform(key, (B,), dtype=jnp.float32)
    )
    scale = (random_tensor / keep_prob).astype(x.dtype)
    return x * scale[:, None, None, None]


if __name__ == "__main__":
    key = jax.random.PRNGKey(0)
    B, C, H, W = 2, 4, 16, 16
    k_x, k_drop = jax.random.split(key)
    x = jax.random.normal(k_x, (B, C, H, W), dtype=jnp.float32)

    # 1) Eval mode / drop_prob == 0 -> exact identity (no kernel, like PyTorch).
    out_eval = poolformer_drop_path(x, drop_prob=0.5, training=False)
    assert out_eval is x
    out_p0 = poolformer_drop_path(x, drop_prob=0.0, training=True)
    assert out_p0 is x

    # 2) Training mode with drop_prob > 0 -> Pallas kernel runs.
    drop_prob = 0.5
    out = poolformer_drop_path(x, drop_prob=drop_prob, training=True, key=k_drop)
    out = jax.block_until_ready(out)

    ref = reference_drop_path(x, drop_prob, True, k_drop)
    assert out.shape == (B, C, H, W)
    assert jnp.allclose(out, ref, atol=1e-6, rtol=1e-6), "mismatch vs reference"

    print("KERNEL_OK")
</pallas_src>

<mosaic_0001>
module attributes {stable_mosaic.version = 11 : i64} {
  func.func @drop_path_kernel(%arg0: i32, %arg1: i32, %arg2: memref<1x1x1xf32, #tpu.memory_space<vmem>>, %arg3: memref<1x1x1024xf32, #tpu.memory_space<vmem>>, %arg4: memref<1x1x1024xf32, #tpu.memory_space<vmem>>) attributes {dimension_semantics = [#tpu.dimension_semantics<parallel>, #tpu.dimension_semantics<parallel>], iteration_bounds = array<i64: 2, 1>, scalar_prefetch = 0 : i64, scratch_operands = 0 : i64, tpu.core_type = #tpu.core_type<tc>, window_params = [{transform_indices = @transform_0, window_bounds = array<i64: 1, 1, 1>}, {transform_indices = @transform_1, window_bounds = array<i64: 1, 1, 1024>}, {transform_indices = @transform_2, window_bounds = array<i64: 1, 1, 1024>}]} {
    %c0 = arith.constant 0 : index
    %c0_0 = arith.constant 0 : index
    %c0_1 = arith.constant 0 : index
    %0 = vector.load %arg3[%c0, %c0_0, %c0_1] : memref<1x1x1024xf32, #tpu.memory_space<vmem>>, vector<1x1x1024xf32>
    %c0_2 = arith.constant 0 : index
    %c0_3 = arith.constant 0 : index
    %c0_4 = arith.constant 0 : index
    %1 = vector.load %arg2[%c0_2, %c0_3, %c0_4] : memref<1x1x1xf32, #tpu.memory_space<vmem>>, vector<1x1x1xf32>
    %2 = vector.broadcast %1 : vector<1x1x1xf32> to vector<1x1x1024xf32>
    %3 = arith.mulf %0, %2 : vector<1x1x1024xf32>
    %c0_5 = arith.constant 0 : index
    %c0_6 = arith.constant 0 : index
    %c0_7 = arith.constant 0 : index
    %4 = vector.load %arg4[%c0_5, %c0_6, %c0_7] : memref<1x1x1024xf32, #tpu.memory_space<vmem>>, vector<1x1x1024xf32>
    tpu.vector_store %arg4[%c0_5, %c0_6, %c0_7], %3 {strides = array<i32>} : memref<1x1x1024xf32, #tpu.memory_space<vmem>>, vector<1x1x1024xf32>,
    return
  }
  func.func @transform_0(%arg0: i32, %arg1: i32) -> (i32, i32, i32) {
    %c0_i32 = arith.constant 0 : i32
    %c0_i32_0 = arith.constant 0 : i32
    %c0_i32_1 = arith.constant 0 : i32
    return %arg0, %c0_i32, %c0_i32_0 : i32, i32, i32
  }
  func.func @transform_1(%arg0: i32, %arg1: i32) -> (i32, i32, i32) {
    %c0_i32 = arith.constant 0 : i32
    %c0_i32_0 = arith.constant 0 : i32
    return %arg0, %arg1, %c0_i32 : i32, i32, i32
  }
  func.func @transform_2(%arg0: i32, %arg1: i32) -> (i32, i32, i32) {
    %c0_i32 = arith.constant 0 : i32
    %c0_i32_0 = arith.constant 0 : i32
    return %arg0, %arg1, %c0_i32 : i32, i32, i32
  }
}

</mosaic_0001>

<bundles_post_ra>
// kernel: _drop_path_pallas.1
= control target key start
LH: loop header
LB: loop body
LE: loop exit
PB: predicated region body
PF: predicated region fallthrough
CT: control target
= control target key end

     0   :  { %s369_s9 = smov 0   ;;  %s371_s10 = smov 0   ;;  %s402_s0 = inlined_call_operand.vmem [shape: f32[2,1,1], index: 0, kind: input, shape index: {}]   ;;  %s403_s1 = inlined_call_operand.vmem [shape: f32[2,1,1024], index: 1, kind: input, shape index: {}]   ;;  %s404_s2 = inlined_call_operand.vmem [shape: f32[2,1,1024], index: 2, kind: output, shape index: {}]  }
   0x1   :  { %s373_s11 = smov 0  }
   0x2 LB: > { %s24_s12 = sadd.s32 1, %s347_s10  ;;  %p298_p0 = scmp.ge.s32.totalorder %s351_s11, 1  ;;  %s351_s11 = sphi %s373_s11, %s12_s11   ;;  %s347_s10 = sphi %s371_s10, %s406_s10   ;;  %s343_s9 = sphi %s369_s9, %s405_s9  }
   0x3   : > { %p26_p1 = scmp.ge.s32.totalorder %s24_s12, 2  ;;  %p139_p2 = scmp.lt.s32.totalorder %s351_s11, 3 }
   0x5   : > { %s408_s12 = smov (%p26_p1, %s24_s12), 0  ;;  %p140_p3 = pnand %p298_p0, %p139_p2 }
   0x6   : > { %p170_p4 = scmp.lt.s32.totalorder (!%p140_p3), %s343_s9, 1 }
   0x7   : > { %143 = sbr.rel (%p140_p3) target bundleno = 144 (0x90), region = 28 }
   0xc   : > { %v353_v0 = vmov 0   ;;  %s410_s9 = smov (!%p170_p4, %s343_s9), 1  ;;  %v196_v2 = vlaneseq }
   0xd   : > { %328 = vset.pattern.permute.xlu0 %v353_v0  ;;  %s172_s15 = scalar_lea.vmem %s402_s0, %s410_s9  ;;  %s299_s16 = sshll.u32 %s410_s9, 3 }
   0xe   : > { %v190_v1 = vld [vmem:[%s172_s15] sm:$0x1]  ;;  %v197_v3 = vshrl.u32 %v196_v2, 7  ;;  %s180_s19 = scalar_lea.vmem %s403_s1, %s299_s16  ;;  %s188_s22 = scalar_lea.vmem %s404_s2, %s299_s16 }
   0xf   : > { %193 = vperm.xlu0 %328, %v190_v1   ;;  %v189_v5 = vld [vmem:[%s180_s19] sm:$0xff] }
  0x10   : > { %v198_v4 = vsub.s32 0, %v197_v3 }
  0x8a   : > { %v194_v6 = vpop.permute.xlu0 %193 }
  0x8b   : > { %v199_v7 = vrot.slane %v194_v6, %v198_v4 }
  0x8d   : > { %v200_v8 = vmul.f32 %v199_v7, %v189_v5 }
  0x8f   : > { %201 = vst [vmem:[%s188_s22] sm:$0xff] %v200_v8 }
  0x90 PF: > { %s12_s11 = sadd.s32 1, %s351_s11   ;;  %s405_s9 = smov %s347_s10 }
  0x91   : > { %p9_p5 = scmp.ge.s32.totalorder %s12_s11, 4   ;;  %s406_s10 = smov %s408_s12 }
  0x93   :  { %11 = sbr.rel (!%p9_p5) target bundleno = 2 (0x2), region = 61 }

</bundles_post_ra>
